<compile_context>
chip_gen: v6e
topology: v6e:2x2x1
jax: 0.10.0
libtpu: 0.0.40
codegen_flags: <defaults>
</compile_context>

<pallas_src>
import functools

import jax
import jax.numpy as jnp
from jax.experimental import pallas as pl
from jax.experimental.pallas import tpu as pltpu


def _round_up(x: int, m: int) -> int:
    return ((x + m - 1) // m) * m


def dense_block_kernel(x_ref, w_ref, b_ref, o_ref):
    # x_ref: [tm, tk] bf16, w_ref: [tk, tn] bf16, b_ref: [1, tn] f32,
    # o_ref: [tm, tn] f32 (resident across the K axis -> acts as the accumulator).
    k = pl.program_id(2)

    @pl.when(k == 0)
    def _():
        o_ref[...] = jnp.zeros_like(o_ref)

    o_ref[...] += jnp.dot(
        x_ref[...], w_ref[...], preferred_element_type=jnp.float32
    )

    @pl.when(k == pl.num_programs(2) - 1)
    def _():
        # Bias + ReLU epilogue in f32 (act_fn = nn.ReLU in this instantiation).
        o_ref[...] = jnp.maximum(o_ref[...] + b_ref[...], 0.0)


def prepare_dense_block(w, b, *, tn_cap=512, tk_cap=1024):
    """One-time (init-time) parameter prep: pad W/b to tile multiples, cast W to bf16.

    Done outside the per-call path so the weight pad/cast is not re-executed
    every forward call.
    """
    Fin, Fout = w.shape
    tn = min(_round_up(Fout, 128), tn_cap)
    tk = min(_round_up(Fin, 128), tk_cap)
    Fin_pad = _round_up(Fin, tk)
    Fout_pad = _round_up(Fout, tn)
    w_p = jnp.pad(w, ((0, Fin_pad - Fin), (0, Fout_pad - Fout))).astype(jnp.bfloat16)
    b_p = jnp.pad(b.reshape(1, Fout), ((0, 0), (0, Fout_pad - Fout))).astype(
        jnp.float32
    )
    meta = {"Fin": Fin, "Fout": Fout, "tn": tn, "tk": tk}
    return w_p, b_p, meta


@functools.partial(jax.jit, static_argnames=("Fout", "tn", "tk", "tm_cap"))
def _dense_block_apply(x, w_p, b_p, *, Fout, tn, tk, tm_cap):
    B, Fin = x.shape
    Fin_pad, Fout_pad = w_p.shape

    # Batch tile: multiple of 16 (bf16 sublane packing); small batches keep the
    # full (padded) batch in one tile (pure weight-streaming regime).
    tm = min(_round_up(B, 16), tm_cap)
    B_pad = _round_up(B, tm)

    # Only x is padded/cast per call; zero K-columns contribute 0 to the dot.
    x_p = jnp.pad(x, ((0, B_pad - B), (0, Fin_pad - Fin))).astype(jnp.bfloat16)

    n_i, n_j, n_k = B_pad // tm, Fout_pad // tn, Fin_pad // tk
    grid = (n_i, n_j, n_k)

    # Deeper buffering on the streamed weight blocks for the small-batch regime.
    w_spec_kwargs = {}
    if B_pad <= 128 and n_k >= 3:
        w_spec_kwargs["pipeline_mode"] = pl.Buffered(3)
    w_spec = pl.BlockSpec((tk, tn), lambda i, j, k: (k, j), **w_spec_kwargs)

    # Advisory cost estimate: account for operand re-streaming.
    bpe_in = 2  # bf16 operands
    flops = 2 * B_pad * Fin_pad * Fout_pad
    bytes_accessed = (
        B_pad * Fin_pad * bpe_in * n_j      # x streamed once per N tile
        + Fin_pad * Fout_pad * bpe_in * n_i  # W streamed once per M tile
        + Fout_pad * 4 * n_i                 # bias
        + B_pad * Fout_pad * 4               # f32 output
    )

    out_p = pl.pallas_call(
        dense_block_kernel,
        out_shape=jax.ShapeDtypeStruct((B_pad, Fout_pad), jnp.float32),
        grid_spec=pltpu.PrefetchScalarGridSpec(
            num_scalar_prefetch=0,
            grid=grid,
            in_specs=[
                pl.BlockSpec((tm, tk), lambda i, j, k: (i, k)),
                w_spec,
                pl.BlockSpec((1, tn), lambda i, j, k: (0, j)),
            ],
            out_specs=pl.BlockSpec((tm, tn), lambda i, j, k: (i, j)),
        ),
        compiler_params=pltpu.CompilerParams(
            dimension_semantics=("parallel", "parallel", "arbitrary"),
            vmem_limit_bytes=48 * 1024 * 1024,
        ),
        cost_estimate=pl.CostEstimate(
            flops=flops, transcendentals=0, bytes_accessed=bytes_accessed
        ),
    )(x_p, w_p, b_p)

    return out_p[:B, :Fout].astype(x.dtype)


def dense_block(x, params, *, tm_cap=512):
    """y = relu(x @ W + b) using pre-padded bf16 params from prepare_dense_block."""
    w_p, b_p, meta = params
    return _dense_block_apply(
        x, w_p, b_p, Fout=meta["Fout"], tn=meta["tn"], tk=meta["tk"], tm_cap=tm_cap
    )


def reference(x, w, b):
    return jnp.maximum(x @ w + b.reshape(1, -1), 0.0)


if __name__ == "__main__":
    key = jax.random.PRNGKey(0)
    kx, kw, kb = jax.random.split(key, 3)

    batch = 8
    in_features = 32
    out_features = 64

    # Deterministic "PyTorch-like" init: U(-1/sqrt(fan_in), 1/sqrt(fan_in))
    bound = 1.0 / (in_features ** 0.5)
    x = jax.random.normal(kx, (batch, in_features), dtype=jnp.float32)
    w = jax.random.uniform(kw, (in_features, out_features),
                           minval=-bound, maxval=bound, dtype=jnp.float32)
    b = jax.random.uniform(kb, (out_features,),
                           minval=-bound, maxval=bound, dtype=jnp.float32)

    params = prepare_dense_block(w, b)   # one-time weight pad + bf16 cast
    y = dense_block(x, params)
    y = jax.block_until_ready(y)

    y_ref = reference(x, w, b)
    assert y.shape == (batch, out_features)
    # bf16 operands with f32 accumulation -> slightly looser tolerance than pure f32.
    assert jnp.allclose(y, y_ref, atol=2e-2, rtol=2e-2), float(
        jnp.max(jnp.abs(y - y_ref))
    )

    print("KERNEL_OK")
</pallas_src>

<mosaic_0001>
module attributes {stable_mosaic.version = 11 : i64} {
  func.func @dense_block_kernel(%arg0: i32, %arg1: i32, %arg2: i32, %arg3: memref<16x128xbf16, #tpu.memory_space<vmem>>, %arg4: memref<128x128xbf16, #tpu.memory_space<vmem>>, %arg5: memref<1x128xf32, #tpu.memory_space<vmem>>, %arg6: memref<16x128xf32, #tpu.memory_space<vmem>>) attributes {dimension_semantics = [#tpu.dimension_semantics<parallel>, #tpu.dimension_semantics<parallel>, #tpu.dimension_semantics<arbitrary>], iteration_bounds = array<i64: 1, 1, 1>, scalar_prefetch = 0 : i64, scratch_operands = 0 : i64, tpu.core_type = #tpu.core_type<tc>, window_params = [{transform_indices = @transform_0, window_bounds = array<i64: 16, 128>}, {transform_indices = @transform_1, window_bounds = array<i64: 128, 128>}, {transform_indices = @transform_2, window_bounds = array<i64: 1, 128>}, {transform_indices = @transform_3, window_bounds = array<i64: 16, 128>}]} {
    %c0_i32 = arith.constant 0 : i32
    %0 = arith.cmpi eq, %arg2, %c0_i32 : i32
    %1 = arith.extui %0 : i1 to i32
    %c0_i32_0 = arith.constant 0 : i32
    %2 = arith.cmpi ne, %1, %c0_i32_0 : i32
    scf.if %2 {
      %cst_10 = arith.constant 0.000000e+00 : f32
      %12 = vector.broadcast %cst_10 : f32 to vector<16x128xf32>
      %c0_11 = arith.constant 0 : index
      %c0_12 = arith.constant 0 : index
      %13 = vector.load %arg6[%c0_11, %c0_12] : memref<16x128xf32, #tpu.memory_space<vmem>>, vector<16x128xf32>
      tpu.vector_store %arg6[%c0_11, %c0_12], %12 {strides = array<i32>} : memref<16x128xf32, #tpu.memory_space<vmem>>, vector<16x128xf32>,
    } else {
    }
    %c0 = arith.constant 0 : index
    %c0_1 = arith.constant 0 : index
    %3 = vector.load %arg6[%c0, %c0_1] : memref<16x128xf32, #tpu.memory_space<vmem>>, vector<16x128xf32>
    %c0_2 = arith.constant 0 : index
    %c0_3 = arith.constant 0 : index
    %4 = vector.load %arg3[%c0_2, %c0_3] : memref<16x128xbf16, #tpu.memory_space<vmem>>, vector<16x128xbf16>
    %c0_4 = arith.constant 0 : index
    %c0_5 = arith.constant 0 : index
    %5 = vector.load %arg4[%c0_4, %c0_5] : memref<128x128xbf16, #tpu.memory_space<vmem>>, vector<128x128xbf16>
    %cst = arith.constant dense<0.000000e+00> : vector<16x128xf32>
    %6 = tpu.matmul %4, %5, %cst {dimension_numbers = #tpu.dot_dimension_numbers<[1], [0], [0], [1], [0, 0, 1, 1], [], []>} : vector<16x128xbf16>, vector<128x128xbf16>, vector<16x128xf32> -> vector<16x128xf32>
    %7 = arith.addf %3, %6 : vector<16x128xf32>
    %c0_6 = arith.constant 0 : index
    %c0_7 = arith.constant 0 : index
    %8 = vector.load %arg6[%c0_6, %c0_7] : memref<16x128xf32, #tpu.memory_space<vmem>>, vector<16x128xf32>
    tpu.vector_store %arg6[%c0_6, %c0_7], %7 {strides = array<i32>} : memref<16x128xf32, #tpu.memory_space<vmem>>, vector<16x128xf32>,
    %c0_i32_8 = arith.constant 0 : i32
    %9 = arith.cmpi eq, %arg2, %c0_i32_8 : i32
    %10 = arith.extui %9 : i1 to i32
    %c0_i32_9 = arith.constant 0 : i32
    %11 = arith.cmpi ne, %10, %c0_i32_9 : i32
    scf.if %11 {
      %c0_10 = arith.constant 0 : index
      %c0_11 = arith.constant 0 : index
      %12 = vector.load %arg6[%c0_10, %c0_11] : memref<16x128xf32, #tpu.memory_space<vmem>>, vector<16x128xf32>
      %c0_12 = arith.constant 0 : index
      %c0_13 = arith.constant 0 : index
      %13 = vector.load %arg5[%c0_12, %c0_13] : memref<1x128xf32, #tpu.memory_space<vmem>>, vector<1x128xf32>
      %14 = vector.broadcast %13 : vector<1x128xf32> to vector<16x128xf32>
      %15 = arith.addf %12, %14 : vector<16x128xf32>
      %cst_14 = arith.constant 0.000000e+00 : f32
      %16 = vector.broadcast %cst_14 : f32 to vector<16x128xf32>
      %17 = arith.maximumf %15, %16 : vector<16x128xf32>
      %c0_15 = arith.constant 0 : index
      %c0_16 = arith.constant 0 : index
      %18 = vector.load %arg6[%c0_15, %c0_16] : memref<16x128xf32, #tpu.memory_space<vmem>>, vector<16x128xf32>
      tpu.vector_store %arg6[%c0_15, %c0_16], %17 {strides = array<i32>} : memref<16x128xf32, #tpu.memory_space<vmem>>, vector<16x128xf32>,
    } else {
    }
    return
  }
  func.func @transform_0(%arg0: i32, %arg1: i32, %arg2: i32) -> (i32, i32) {
    %c0_i32 = arith.constant 0 : i32
    return %arg0, %arg2 : i32, i32
  }
  func.func @transform_1(%arg0: i32, %arg1: i32, %arg2: i32) -> (i32, i32) {
    %c0_i32 = arith.constant 0 : i32
    return %arg2, %arg1 : i32, i32
  }
  func.func @transform_2(%arg0: i32, %arg1: i32, %arg2: i32) -> (i32, i32) {
    %c0_i32 = arith.constant 0 : i32
    %c0_i32_0 = arith.constant 0 : i32
    return %c0_i32, %arg1 : i32, i32
  }
  func.func @transform_3(%arg0: i32, %arg1: i32, %arg2: i32) -> (i32, i32) {
    %c0_i32 = arith.constant 0 : i32
    return %arg0, %arg1 : i32, i32
  }
}

</mosaic_0001>

<bundles_post_ra>
// kernel: _dense_block_apply.1
= control target key start
LH: loop header
LB: loop body
LE: loop exit
PB: predicated region body
PF: predicated region fallthrough
CT: control target
= control target key end

     0   :  { %8 = vsyncpa [#allocation3], 0  ;;  %s252_s12 = smov [#allocation2]   ;;  %s292_s0 = inlined_call_operand.vmem [shape: bf16[16,128], index: 0, kind: input, shape index: {}]   ;;  %s293_s1 = inlined_call_operand.hbm [shape: bf16[128,128], index: 1, kind: input, shape index: {}]   ;;  %s294_s2 = inlined_call_operand.vmem [shape: f32[1,128], index: 2, kind: input, shape index: {}]   ;;  %s295_s3 = inlined_call_operand.vmem [shape: f32[16,128], index: 3, kind: output, shape index: {}]  }
   0x1   :  { %s16_s13 = sshll.u32 %s252_s12, 4  ;;  %s17_s13 = int_to_ptr.vmem [resolvable:$true] %s16_s13 }
   0x2   :  { %s238_s14 = scalar_lea.vmem %s17_s13, 1024  ;;  %p243_p1 = scmp.lt.s32.totalorder %s17_s13, %s17_s13 }
   0x3   :  { %p239_p0 = scmp.ne.s32.totalorder %s17_s13, %s238_s14  ;;  %p244_p2 = scmp.lt.s32.totalorder %s238_s14, %s238_s14 }
   0x5   :  { %p245_p3 = por %p244_p2, %p243_p1 }
   0x7   :  { %p246_p4 = pnand %p245_p3, %p239_p0 }
   0x9   :  { %249 = shalt.err (!%p246_p4)
}
   0xa   :  { %s253_s15 = smov 64   ;;  %s254_s16 = smov 4  }
   0xb   :  { %22 = dma.hbm_to_vmem [thread:$0]  %s293_s1, 1024, %s17_s13, [#allocation3], %s253_s15, %s253_s15, %s254_s16  }
   0xc   :  { %250 = dma.done.wait [#allocation3], 1024  }
   0xd   :  { %251 = vsyncadd [#allocation3], 4294966272  ;;  %v255_v0 = vmov 0.0   ;;  %vm256_vm0 = vmmov 0   ;;  %v221_v1 = vld [vmem:[#allocation2 + $0x38] sm:$0xff]   ;;  %v222_v2 = vld [vmem:[#allocation2 + $0x30] sm:$0xff]  }
   0xe   :  { %196 = vmatprep.subr.bf16.mxu0 %v255_v0  ;;  %212 = vmatprep.mubr.msk.bf16.mxu0 %vm256_vm0, %v255_v0  ;;  %v223_v3 = vld [vmem:[#allocation2 + $0x28] sm:$0xff]   ;;  %v224_v4 = vld [vmem:[#allocation2 + $0x20] sm:$0xff]   ;;  %v225_v5 = vld [vmem:[#allocation2 + $0x18] sm:$0xff]  }
   0xf   :  { %197 = vmatpush3.bf16.msra.mxu0 %v221_v1  ;;  %v226_v6 = vld [vmem:[#allocation2 + $0x10] sm:$0xff]   ;;  %v227_v7 = vld [vmem:[#allocation2 + $0x8] sm:$0xff]   ;;  %v228_v8 = vld [vmem:[#allocation2] sm:$0xff]  }
  0x10   :  { %198 = vmatprep.subr.bf16.mxu0 %v255_v0  ;;  %v229_v9 = vld [vmem:[%s292_s0] sm:$0xff]  }
  0x11   :  { %v186_v11 = vld [vmem:[%s294_s2] ss:$0 sm:$0xff] }
  0x13   :  { %199 = vmatpush3.bf16.msra.mxu0 %v222_v2 }
  0x14   :  { %200 = vmatprep.subr.bf16.mxu0 %v255_v0 }
  0x17   :  { %201 = vmatpush3.bf16.msra.mxu0 %v223_v3 }
  0x18   :  { %202 = vmatprep.subr.bf16.mxu0 %v255_v0 }
  0x1b   :  { %203 = vmatpush3.bf16.msra.mxu0 %v224_v4 }
  0x1c   :  { %204 = vmatprep.subr.bf16.mxu0 %v255_v0 }
  0x1f   :  { %205 = vmatpush3.bf16.msra.mxu0 %v225_v5 }
  0x20   :  { %206 = vmatprep.subr.bf16.mxu0 %v255_v0 }
  0x23   :  { %207 = vmatpush3.bf16.msra.mxu0 %v226_v6 }
  0x24   :  { %208 = vmatprep.subr.bf16.mxu0 %v255_v0 }
  0x27   :  { %209 = vmatpush3.bf16.msra.mxu0 %v227_v7 }
  0x28   :  { %210 = vmatprep.subr.bf16.mxu0 %v255_v0 }
  0x2b   :  { %211 = vmatpush3.bf16.msra.mxu0 %v228_v8 }
  0x2e   :  { %213 = vmatmul.mubr.bf16.vlgmr.msra.gmra.mxu0 %v229_v9 }
  0xee   :  { %v143_v10 = vpop.f32.mrf.mxu0 }
  0xef   :  { %v166_v13 = vadd.f32 %v186_v11, %v143_v10 }
  0xf0   :  { %v214_v12 = vpop.f32.mrf.mxu0 }
  0xf1   :  { %v168_v15 = vmax.f32 %v166_v13, 0.0 }
  0xf2   :  { %v146_v14 = vpop.f32.mrf.mxu0 }
  0xf3   :  { %170 = vst [vmem:[%s295_s3] sm:$0xff] %v168_v15  ;;  %v167_v17 = vadd.f32 %v186_v11, %v146_v14 }
  0xf4   :  { %v215_v16 = vpop.f32.mrf.mxu0 }
  0xf5   :  { %v169_v18 = vmax.f32 %v167_v17, 0.0 }
  0xf7   :  { %171 = vst [vmem:[%s295_s3 + $0x8] sm:$0xff] %v169_v18 }
  0xf8   :  { %176 = vsyncpa [#allocation3], 1 }

</bundles_post_ra>
